<compile_context>
chip_gen: v7x
topology: tpu7x:2x2x1
jax: 0.10.0
libtpu: 0.0.40
codegen_flags: <defaults>
</compile_context>

<pallas_src>
import jax
import jax.numpy as jnp
from jax.experimental import pallas as pl
from jax.experimental.pallas import tpu as pltpu


def _round_up(x, m):
    return (x + m - 1) // m * m


def gmf_kernel(u_ref, v_ref, w_ref, b_ref, pred_ref, logit_ref):
    """GMF interaction + Linear(F->1) done as VPU multiply + lane reduce (no MXU)."""
    pred = u_ref[...] * v_ref[...]                       # (TILE_B, F)  GMF interaction
    pred_ref[...] = pred
    # Linear(F -> 1): elementwise mul with the (1, F) weight row, then lane-reduce.
    # Rides in otherwise-idle VPU/XLU slots of this memory-bound kernel.
    logit_ref[...] = jnp.sum(pred * w_ref[...], axis=-1, keepdims=True) + b_ref[0]


def _choose_tile_b(B, F, itemsize=4, vmem_budget=24 << 20):
    """Batch tile: big enough for HBM roofline, small enough for v7x 64 MiB VMEM.

    Per-step working set ~ (2 inputs + 1 pred output) * double-buffer
                         ~ 6 * TILE_B * F * itemsize bytes.
    """
    cap = max(8, (vmem_budget // (6 * F * itemsize)) // 8 * 8)
    tile = min(1024, cap)                 # ~512-2048 rows hits 85%+ of HBM roofline
    tile = min(tile, _round_up(B, 8))     # don't over-tile tiny batches
    return tile


@jax.jit
def gmf_forward(user_emb_table, item_emb_table, w, b, user_idx, item_idx):
    """GMF forward. Embedding gather is XLA glue; interaction + logit are the kernel."""
    # TODO(synk): with F=32 a fused in-kernel row gather is only a 128 B DMA per row;
    # the XLA gather is kept deliberately. Revisit fused gather (PrefetchScalarGridSpec
    # + pl.ANY tables) for large n_factors to avoid u/v crossing HBM twice.
    u = jnp.take(user_emb_table, user_idx, axis=0).astype(jnp.float32)   # (B, F)
    v = jnp.take(item_emb_table, item_idx, axis=0).astype(jnp.float32)   # (B, F)
    B, F = u.shape

    tile_b = _choose_tile_b(B, F)
    B_pad = _round_up(B, tile_b)
    if B_pad != B:
        pad = B_pad - B
        u = jnp.pad(u, ((0, pad), (0, 0)))
        v = jnp.pad(v, ((0, pad), (0, 0)))
    num_tiles = B_pad // tile_b

    w_row = w.reshape(1, F).astype(jnp.float32)          # (1, F) weight row
    b_s = b.reshape(1).astype(jnp.float32)               # (1,) scalar bias -> SMEM

    pred, logit = pl.pallas_call(
        gmf_kernel,
        grid=(num_tiles,),
        out_shape=(
            jax.ShapeDtypeStruct((B_pad, F), jnp.float32),
            jax.ShapeDtypeStruct((B_pad, 1), jnp.float32),
        ),
        in_specs=[
            pl.BlockSpec((tile_b, F), lambda i: (i, 0)),                    # u tile
            pl.BlockSpec((tile_b, F), lambda i: (i, 0)),                    # v tile
            pl.BlockSpec((1, F), lambda i: (0, 0)),                         # weight row
            pl.BlockSpec(memory_space=pltpu.MemorySpace.SMEM),              # bias scalar
        ],
        out_specs=(
            pl.BlockSpec((tile_b, F), lambda i: (i, 0)),                    # pred tile
            pl.BlockSpec((tile_b, 1), lambda i: (i, 0)),                    # logit tile
        ),
        compiler_params=pltpu.CompilerParams(
            dimension_semantics=("parallel",)),
    )(u, v, w_row, b_s)

    return pred[:B], logit[:B, 0]                        # ((B, F), (B,))


def init_params(key, n_users, n_items, n_factors):
    """Deterministic init mirroring the nn.Module shapes/defaults."""
    k1, k2, k3, k4 = jax.random.split(key, 4)
    # nn.Embedding default: N(0, 1); padding_idx row zeroed.
    embed_user = jax.random.normal(k1, (n_users + 1, n_factors), jnp.float32)
    embed_user = embed_user.at[n_users].set(0.0)
    embed_item = jax.random.normal(k2, (n_items + 1, n_factors), jnp.float32)
    embed_item = embed_item.at[n_items].set(0.0)
    # nn.Linear default: U(-1/sqrt(F), 1/sqrt(F)) for weight and bias.
    bound = 1.0 / jnp.sqrt(jnp.float32(n_factors))
    w = jax.random.uniform(k3, (1, n_factors), jnp.float32, -bound, bound)
    b = jax.random.uniform(k4, (1,), jnp.float32, -bound, bound)
    return embed_user, embed_item, w, b


def _reference(embed_user, embed_item, w, b, user_idx, item_idx):
    u = embed_user[user_idx]
    v = embed_item[item_idx]
    pred = u * v
    logit = (pred @ w.T + b).squeeze(-1)
    return pred, logit


if __name__ == "__main__":
    n_users, n_items, n_factors = 10, 20, 32

    key = jax.random.PRNGKey(0)
    kp, ku, ki = jax.random.split(key, 3)
    embed_user, embed_item, w, b = init_params(kp, n_users, n_items, n_factors)

    # Case 1: batch already a multiple of 8.
    B = 8
    user_idx = jax.random.randint(ku, (B,), 0, n_users + 1, dtype=jnp.int32)
    item_idx = jax.random.randint(ki, (B,), 0, n_items + 1, dtype=jnp.int32)

    pred_vector, logit = gmf_forward(embed_user, embed_item, w, b, user_idx, item_idx)
    jax.block_until_ready((pred_vector, logit))

    pred_ref, logit_ref = _reference(embed_user, embed_item, w, b, user_idx, item_idx)
    assert pred_vector.shape == (B, n_factors) and logit.shape == (B,)
    assert jnp.allclose(pred_vector, pred_ref, atol=1e-5)
    assert jnp.allclose(logit, logit_ref, atol=1e-5)

    # Case 2: ragged batch (exercises the pad-to-tile + slice-back path).
    B2 = 13
    ku2, ki2 = jax.random.split(jax.random.PRNGKey(1), 2)
    user_idx2 = jax.random.randint(ku2, (B2,), 0, n_users + 1, dtype=jnp.int32)
    item_idx2 = jax.random.randint(ki2, (B2,), 0, n_items + 1, dtype=jnp.int32)

    pred2, logit2 = gmf_forward(embed_user, embed_item, w, b, user_idx2, item_idx2)
    jax.block_until_ready((pred2, logit2))

    pred2_ref, logit2_ref = _reference(embed_user, embed_item, w, b, user_idx2, item_idx2)
    assert pred2.shape == (B2, n_factors) and logit2.shape == (B2,)
    assert jnp.allclose(pred2, pred2_ref, atol=1e-5)
    assert jnp.allclose(logit2, logit2_ref, atol=1e-5)

    print("KERNEL_OK")
</pallas_src>

<mosaic_0001>
module attributes {stable_mosaic.version = 11 : i64} {
  func.func @gmf_kernel(%arg0: i32, %arg1: memref<8x32xf32, #tpu.memory_space<vmem>>, %arg2: memref<8x32xf32, #tpu.memory_space<vmem>>, %arg3: memref<1x32xf32, #tpu.memory_space<vmem>>, %arg4: memref<1xf32, #tpu.memory_space<smem>>, %arg5: memref<8x32xf32, #tpu.memory_space<vmem>>, %arg6: memref<8x1xf32, #tpu.memory_space<vmem>>) attributes {dimension_semantics = [#tpu.dimension_semantics<parallel>], iteration_bounds = array<i64: 1>, scalar_prefetch = 0 : i64, scratch_operands = 0 : i64, tpu.core_type = #tpu.core_type<tc>, window_params = [{transform_indices = @transform_0, window_bounds = array<i64: 8, 32>}, {transform_indices = @transform_1, window_bounds = array<i64: 8, 32>}, {pipeline_mode = #tpu.pipeline_mode<synchronous>, transform_indices = @transform_2, window_bounds = array<i64: 1, 32>}, {transform_indices = @transform_3, window_bounds = array<i64: 1>}, {transform_indices = @transform_4, window_bounds = array<i64: 8, 32>}, {transform_indices = @transform_5, window_bounds = array<i64: 8, 1>}]} {
    %c0 = arith.constant 0 : index
    %c0_0 = arith.constant 0 : index
    %0 = vector.load %arg1[%c0, %c0_0] : memref<8x32xf32, #tpu.memory_space<vmem>>, vector<8x32xf32>
    %c0_1 = arith.constant 0 : index
    %c0_2 = arith.constant 0 : index
    %1 = vector.load %arg2[%c0_1, %c0_2] : memref<8x32xf32, #tpu.memory_space<vmem>>, vector<8x32xf32>
    %2 = arith.mulf %0, %1 : vector<8x32xf32>
    %c0_3 = arith.constant 0 : index
    %c0_4 = arith.constant 0 : index
    %3 = vector.load %arg5[%c0_3, %c0_4] : memref<8x32xf32, #tpu.memory_space<vmem>>, vector<8x32xf32>
    tpu.vector_store %arg5[%c0_3, %c0_4], %2 {strides = array<i32>} : memref<8x32xf32, #tpu.memory_space<vmem>>, vector<8x32xf32>,
    %c0_5 = arith.constant 0 : index
    %c0_6 = arith.constant 0 : index
    %4 = vector.load %arg3[%c0_5, %c0_6] : memref<1x32xf32, #tpu.memory_space<vmem>>, vector<1x32xf32>
    %5 = vector.broadcast %4 : vector<1x32xf32> to vector<8x32xf32>
    %6 = arith.mulf %2, %5 : vector<8x32xf32>
    %cst = arith.constant dense<0.000000e+00> : vector<8xf32>
    %7 = vector.multi_reduction <add>, %6, %cst [1] : vector<8x32xf32> to vector<8xf32>
    %8 = vector.shape_cast %7 : vector<8xf32> to vector<8x1xf32>
    %c0_7 = arith.constant 0 : index
    %9 = memref.load %arg4[%c0_7] : memref<1xf32, #tpu.memory_space<smem>>
    %10 = vector.broadcast %9 : f32 to vector<8x1xf32>
    %11 = arith.addf %8, %10 : vector<8x1xf32>
    %c0_8 = arith.constant 0 : index
    %c0_9 = arith.constant 0 : index
    %12 = vector.load %arg6[%c0_8, %c0_9] : memref<8x1xf32, #tpu.memory_space<vmem>>, vector<8x1xf32>
    tpu.vector_store %arg6[%c0_8, %c0_9], %11 {strides = array<i32>} : memref<8x1xf32, #tpu.memory_space<vmem>>, vector<8x1xf32>,
    return
  }
  func.func @transform_0(%arg0: i32) -> (i32, i32) {
    %c0_i32 = arith.constant 0 : i32
    %c0_i32_0 = arith.constant 0 : i32
    return %arg0, %c0_i32 : i32, i32
  }
  func.func @transform_1(%arg0: i32) -> (i32, i32) {
    %c0_i32 = arith.constant 0 : i32
    %c0_i32_0 = arith.constant 0 : i32
    return %arg0, %c0_i32 : i32, i32
  }
  func.func @transform_2(%arg0: i32) -> (i32, i32) {
    %c0_i32 = arith.constant 0 : i32
    %c0_i32_0 = arith.constant 0 : i32
    %c0_i32_1 = arith.constant 0 : i32
    return %c0_i32, %c0_i32_0 : i32, i32
  }
  func.func @transform_3(%arg0: i32) -> i32 {
    %c0_i32 = arith.constant 0 : i32
    %c0_i32_0 = arith.constant 0 : i32
    return %c0_i32 : i32
  }
  func.func @transform_4(%arg0: i32) -> (i32, i32) {
    %c0_i32 = arith.constant 0 : i32
    %c0_i32_0 = arith.constant 0 : i32
    return %arg0, %c0_i32 : i32, i32
  }
  func.func @transform_5(%arg0: i32) -> (i32, i32) {
    %c0_i32 = arith.constant 0 : i32
    %c0_i32_0 = arith.constant 0 : i32
    return %arg0, %c0_i32 : i32, i32
  }
}

</mosaic_0001>

<bundles_post_ra>
// kernel: gmf_forward.1
= control target key start
LH: loop header
LB: loop body
LE: loop exit
PB: predicated region body
PF: predicated region fallthrough
CT: control target
= control target key end

     0   :  { %s144_s0 = inlined_call_operand.vmem [shape: f32[8,32], index: 0, kind: input, shape index: {}]   ;;  %s145_s1 = inlined_call_operand.vmem [shape: f32[8,32], index: 1, kind: input, shape index: {}]   ;;  %s146_s2 = inlined_call_operand.vmem [shape: f32[1,32], index: 2, kind: input, shape index: {}]   ;;  %s147_s3 = inlined_call_operand.<no memory space> [shape: f32[1], index: 3, kind: input, shape index: {}]   ;;  %s148_s4 = inlined_call_operand.hbm [shape: f32[8,32], index: 4, kind: output, shape index: {0}]   ;;  %s149_s5 = inlined_call_operand.vmem [shape: f32[8,1], index: 5, kind: output, shape index: {1}]  }
   0x1   :  { %v21_v0 = vld [vmem:[%s144_s0] sm:$0xff] }
   0x2   :  { %v22_v1 = vld [vmem:[%s145_s1] sm:$0xff] }
   0x3   :  { %v60_v2 = vld [vmem:[%s146_s2] ss:$0 sm:$0xff]  ;;  %v23_v3 = vmul.f32 %v22_v1, %v21_v0 }
   0x4   :  { %12 = vsyncpa [#allocation4], 0  ;;  %vm24_vm0 = vcmask 261120   ;;  %s86_s24 = smov [#allocation3]  }
   0x5   :  { %v33_v4 = vmul.f32 %v60_v2, %v23_v3  ;;  %25 = vst.msk [vmem:[#allocation3] sm:$0xff] %vm24_vm0, %v23_v3  ;;  %s48_s25 = sshll.u32 %s86_s24, 4  ;;  %s49_s25 = int_to_ptr.vmem [resolvable:$true] %s48_s25 }
   0x6   :  { %s62_s26 = scalar_lea.vmem %s49_s25, 128  ;;  %p67_p1 = scmp.lt.s32.totalorder %s49_s25, %s49_s25 }
   0x7   :  { %v34_v5 = vsel %vm24_vm0, %v33_v4, 0.0  ;;  %p63_p0 = scmp.ne.s32.totalorder %s49_s25, %s62_s26  ;;  %p68_p2 = scmp.lt.s32.totalorder %s62_s26, %s62_s26 }
   0x8   :  { %35 = vadd.xlane.f32.xlu0 %v34_v5 }
   0x9   :  { %p69_p3 = por %p68_p2, %p67_p1 }
   0xb   :  { %p70_p4 = pnand %p69_p3, %p63_p0 }
   0xd   :  { %73 = shalt.err (!%p70_p4)
}
   0xe   :  { %s74_s2 = scalar_lea.hbm %s148_s4, 128 }
   0xf   :  { %p75_p5 = scmp.ne.s32.totalorder %s148_s4, %s74_s2  ;;  %p78_p6 = scmp.lt.u32.totalorder %s74_s2, %s148_s4 }
  0x11   :  { %p80_p7 = pnand %p78_p6, %p75_p5 }
  0x13   :  { %83 = shalt.err (!%p80_p7)
}
  0x14   :  { %51 = dma.vmem_to_hbm [thread:$0]  %s49_s25, 128, %s148_s4, [#allocation4]   ;;  %v38_v6 = vstv %s147_s3  ;;  %vm40_vm1 = vcmask 7168  }
  0x95   :  { %v36_v7 = vpop.xlane.xlu0 %35 }
  0x96   :  { %v39_v8 = vadd.f32 %v38_v6, %v36_v7 }
  0x98   :  { %41 = vst.msk [vmem:[%s149_s5] sm:$0xff] %vm40_vm1, %v39_v8 }
  0x99   :  { %84 = dma.done.wait [#allocation4], 128  }
  0x9a   :  { %85 = vsyncadd [#allocation4], 4294967168 }
  0x9b   :  { %59 = vsyncpa [#allocation4], 1 }

</bundles_post_ra>
